<compile_context>
chip_gen: v7x
topology: tpu7x:2x2x1
jax: 0.10.0
libtpu: 0.0.40
codegen_flags: <defaults>
</compile_context>

<pallas_src>
import jax
import jax.numpy as jnp
from jax.experimental import pallas as pl
from jax.experimental.pallas import tpu as pltpu


def _round_up(x: int, m: int) -> int:
    return ((x + m - 1) // m) * m


# --------------------------------------------------------------------------- #
# Kernel
# --------------------------------------------------------------------------- #
def _attention_kernel(values_ref, mask_ref, w1t_ref, b1_ref, w2_ref,
                      ctx_ref, alpha_ref):
    bB, T, D = values_ref.shape          # static block shape
    H = w1t_ref.shape[1]

    v = values_ref[...]                  # (bB, T, D)  f32 (streamed)
    m = mask_ref[...]                    # (bB, T)     int32
    w1t = w1t_ref[...]                   # (D, H)      bf16 (resident)
    b1 = b1_ref[...]                     # (1, H)      f32  (resident)
    w2 = w2_ref[...]                     # (1, H)      f32  (resident)

    # ---- W1 projection: one flat (bB*T, D) x (D, H) MXU matmul; the bf16
    #      cast happens here (no extra HBM copy), f32 accumulation. ----
    v2d = v.reshape(bB * T, D).astype(w1t.dtype)
    h = jnp.dot(v2d, w1t, preferred_element_type=jnp.float32)   # (bB*T, H) f32
    h = jnp.tanh(h + b1)                 # f32 tanh (EUP); (1, H) broadcast
    h3 = h.reshape(bB, T, H)

    # ---- W2 projection (score): VPU multiply + lane reduce over H. ----
    score = jnp.sum(h3 * w2.reshape(1, 1, H), axis=-1)          # (bB, T) f32

    # ---- masked softmax over the sequence axis (same -inf semantics as the
    #      PyTorch module; a fully-masked row yields NaN, like the reference).
    score = jnp.where(m != 0, score, jnp.float32(-jnp.inf))
    s_max = jnp.max(score, axis=-1, keepdims=True)
    e = jnp.exp(score - s_max)
    denom = jnp.sum(e, axis=-1, keepdims=True)
    alpha = e * pl.reciprocal(denom, approx=True)               # EUP reciprocal
    alpha_ref[...] = alpha

    # ---- context: VPU multiply + sublane (T) reduce — avoids a tail of M=1
    #      MXU matmuls and the alpha -> bf16 cast. ----
    ctx_ref[...] = jnp.sum(alpha[:, :, None] * v, axis=1)       # (bB, D) f32


# --------------------------------------------------------------------------- #
# Generation-aware VMEM budgeting / block-size choice
# --------------------------------------------------------------------------- #
def _vmem_sizes():
    """Returns (vmem_limit_bytes, block_budget_bytes)."""
    try:
        cap = int(pltpu.get_tpu_info().vmem_capacity_bytes)
    except Exception:                       # no query available -> be safe
        cap = 64 * 1024 * 1024              # smallest modern part (v7x per TC)
    vmem_limit = min(cap * 3 // 4, 96 * 1024 * 1024)   # 48 MiB v7x, 96 MiB v5e/v6e
    block_budget = vmem_limit * 3 // 5
    return vmem_limit, block_budget


def _choose_block_b(B_pad, T_pad, D, H_pad, block_budget):
    """Largest multiple-of-8 batch block whose full VMEM footprint fits the
    budget, while keeping >= 2 grid steps when the batch allows it."""
    per_row = (2 * T_pad * D * 4        # values f32, double-buffered
               + T_pad * D * 2          # in-kernel bf16 copy of the values tile
               + 2 * T_pad * 4          # mask int32, double-buffered
               + 2 * T_pad * 4          # alpha f32 output, double-buffered
               + 2 * D * 4              # context f32 output, double-buffered
               + T_pad * H_pad * 4      # h (tanh) f32 intermediate
               + 8 * T_pad * 4)         # score / exp / softmax intermediates
    resident = 2 * D * H_pad * 2 + 4 * H_pad * 4   # W1^T (x2 bufs) + b1 + w2
    avail = max(block_budget - resident, 8 * per_row)
    bB = max(8, (avail // per_row) // 8 * 8)
    if bB >= B_pad:
        bB = B_pad
    if B_pad >= 16:
        # keep >= 2 grid steps: megacore sharding on v7x + DMA/compute overlap.
        bB = min(bB, max(8, (B_pad // 2) // 8 * 8))
    return bB


# --------------------------------------------------------------------------- #
# Wrapper
# --------------------------------------------------------------------------- #
@jax.jit
def attention_forward(values, mask, w1, b1, w2):
    """values: (B,T,D) f32; mask: (B,T) bool/int; w1: (H,D); b1: (1,H) or (H,);
    w2: (1,H).  Returns (context (B,D) f32, alpha (B,T) f32)."""
    B, T, D = values.shape
    H = w1.shape[0]

    T_pad = _round_up(T, 8)              # sublane multiple only (f32 stream)
    H_pad = _round_up(H, 128)            # lane padding for the resident weight

    vmem_limit, block_budget = _vmem_sizes()
    bB = _choose_block_b(_round_up(B, 8), T_pad, D, H_pad, block_budget)
    B_pad = _round_up(B, bB)

    # values: a single fused pad; no D padding, no HBM-materialized cast copy.
    v_p = jnp.pad(values.astype(jnp.float32),
                  ((0, B_pad - B), (0, T_pad - T), (0, 0)))

    # mask: padded T positions masked out (0); padded batch rows stay all-valid
    # (1) so they remain finite (they are sliced off afterwards).
    m_p = jnp.pad(mask.astype(jnp.int32), ((0, 0), (0, T_pad - T)))
    m_p = jnp.pad(m_p, ((0, B_pad - B), (0, 0)), constant_values=1)

    # resident weights (tiny): lane-pad H; zero padding is value-neutral.
    w1t_p = jnp.zeros((D, H_pad), jnp.bfloat16).at[:, :H].set(
        w1.T.astype(jnp.bfloat16))
    b1_p = jnp.zeros((1, H_pad), jnp.float32).at[0, :H].set(
        b1.reshape(-1).astype(jnp.float32))
    w2_p = jnp.zeros((1, H_pad), jnp.float32).at[0, :H].set(
        w2.reshape(-1).astype(jnp.float32))

    ctx_p, alpha_p = pl.pallas_call(
        _attention_kernel,
        out_shape=(jax.ShapeDtypeStruct((B_pad, D), jnp.float32),
                   jax.ShapeDtypeStruct((B_pad, T_pad), jnp.float32)),
        grid=(B_pad // bB,),
        in_specs=[
            pl.BlockSpec((bB, T_pad, D), lambda i: (i, 0, 0)),   # values
            pl.BlockSpec((bB, T_pad), lambda i: (i, 0)),         # mask
            pl.BlockSpec((D, H_pad), lambda i: (0, 0)),          # W1^T (resident)
            pl.BlockSpec((1, H_pad), lambda i: (0, 0)),          # b1   (resident)
            pl.BlockSpec((1, H_pad), lambda i: (0, 0)),          # W2   (resident)
        ],
        out_specs=(
            pl.BlockSpec((bB, D), lambda i: (i, 0)),             # context
            pl.BlockSpec((bB, T_pad), lambda i: (i, 0)),         # alpha
        ),
        compiler_params=pltpu.CompilerParams(
            dimension_semantics=("parallel",),
            vmem_limit_bytes=vmem_limit),
    )(v_p, m_p, w1t_p, b1_p, w2_p)

    return ctx_p[:B], alpha_p[:B, :T]


# --------------------------------------------------------------------------- #
# Reference + self-test
# --------------------------------------------------------------------------- #
def _reference(values, mask_bool, w1, b1, w2):
    h = jnp.tanh(jnp.einsum('btd,hd->bth', values, w1) + b1.reshape(-1))
    score = jnp.einsum('bth,oh->bto', h, w2)[..., 0]
    score = jnp.where(mask_bool, score, -jnp.inf)
    alpha = jax.nn.softmax(score, axis=-1)
    ctx = jnp.sum(alpha[:, :, None] * values, axis=1)
    return ctx, alpha


if __name__ == "__main__":
    # Small shapes consistent with the module: batch=2, seq=8, input_size=32,
    # attention_hidden_size=32.
    B, T, D, H = 2, 8, 32, 32

    key = jax.random.PRNGKey(0)
    k_v, k_w1, k_b1, k_w2 = jax.random.split(key, 4)

    values = jax.random.normal(k_v, (B, T, D), dtype=jnp.float32)
    w1 = jax.random.normal(k_w1, (H, D), dtype=jnp.float32) * 0.1   # W1.weight
    b1 = jax.random.normal(k_b1, (1, H), dtype=jnp.float32) * 0.1   # W1.bias
    w2 = jax.random.normal(k_w2, (1, H), dtype=jnp.float32) * 0.1   # W2.weight

    # Length-style mask: row 0 keeps all 8 positions, row 1 keeps first 5.
    lengths = jnp.array([8, 5], dtype=jnp.int32)
    pos = jnp.arange(T, dtype=jnp.int32)[None, :]
    mask_bool = pos < lengths[:, None]

    ctx, alpha = attention_forward(values, mask_bool, w1, b1, w2)
    jax.block_until_ready((ctx, alpha))

    ctx_ref, alpha_ref = _reference(values, mask_bool, w1, b1, w2)
    # bf16 MXU inputs (f32 accumulation) => relaxed tolerance vs. pure-f32 ref.
    assert jnp.allclose(ctx, ctx_ref, atol=2e-2, rtol=2e-2), "context mismatch"
    assert jnp.allclose(alpha, alpha_ref, atol=2e-2, rtol=2e-2), "alpha mismatch"

    print("KERNEL_OK")
</pallas_src>

<mosaic_0001>
module attributes {stable_mosaic.version = 11 : i64} {
  func.func @_attention_kernel(%arg0: i32, %arg1: memref<8x8x32xf32, #tpu.memory_space<vmem>>, %arg2: memref<8x8xi32, #tpu.memory_space<vmem>>, %arg3: memref<32x128xbf16, #tpu.memory_space<vmem>>, %arg4: memref<1x128xf32, #tpu.memory_space<vmem>>, %arg5: memref<1x128xf32, #tpu.memory_space<vmem>>, %arg6: memref<8x32xf32, #tpu.memory_space<vmem>>, %arg7: memref<8x8xf32, #tpu.memory_space<vmem>>) attributes {dimension_semantics = [#tpu.dimension_semantics<parallel>], iteration_bounds = array<i64: 1>, scalar_prefetch = 0 : i64, scratch_operands = 0 : i64, tpu.core_type = #tpu.core_type<tc>, window_params = [{transform_indices = @transform_0, window_bounds = array<i64: 8, 8, 32>}, {transform_indices = @transform_1, window_bounds = array<i64: 8, 8>}, {pipeline_mode = #tpu.pipeline_mode<synchronous>, transform_indices = @transform_2, window_bounds = array<i64: 32, 128>}, {pipeline_mode = #tpu.pipeline_mode<synchronous>, transform_indices = @transform_3, window_bounds = array<i64: 1, 128>}, {pipeline_mode = #tpu.pipeline_mode<synchronous>, transform_indices = @transform_4, window_bounds = array<i64: 1, 128>}, {transform_indices = @transform_5, window_bounds = array<i64: 8, 32>}, {transform_indices = @transform_6, window_bounds = array<i64: 8, 8>}]} {
    %c0 = arith.constant 0 : index
    %c0_0 = arith.constant 0 : index
    %c0_1 = arith.constant 0 : index
    %0 = vector.load %arg1[%c0, %c0_0, %c0_1] : memref<8x8x32xf32, #tpu.memory_space<vmem>>, vector<8x8x32xf32>
    %c0_2 = arith.constant 0 : index
    %c0_3 = arith.constant 0 : index
    %1 = vector.load %arg2[%c0_2, %c0_3] : memref<8x8xi32, #tpu.memory_space<vmem>>, vector<8x8xi32>
    %c0_4 = arith.constant 0 : index
    %c0_5 = arith.constant 0 : index
    %2 = vector.load %arg3[%c0_4, %c0_5] : memref<32x128xbf16, #tpu.memory_space<vmem>>, vector<32x128xbf16>
    %c0_6 = arith.constant 0 : index
    %c0_7 = arith.constant 0 : index
    %3 = vector.load %arg4[%c0_6, %c0_7] : memref<1x128xf32, #tpu.memory_space<vmem>>, vector<1x128xf32>
    %c0_8 = arith.constant 0 : index
    %c0_9 = arith.constant 0 : index
    %4 = vector.load %arg5[%c0_8, %c0_9] : memref<1x128xf32, #tpu.memory_space<vmem>>, vector<1x128xf32>
    %5 = vector.shape_cast %0 : vector<8x8x32xf32> to vector<64x32xf32>
    %6 = arith.truncf %5 : vector<64x32xf32> to vector<64x32xbf16>
    %cst = arith.constant dense<0.000000e+00> : vector<64x128xf32>
    %7 = tpu.matmul %6, %2, %cst {dimension_numbers = #tpu.dot_dimension_numbers<[1], [0], [0], [1], [0, 0, 1, 1], [], []>} : vector<64x32xbf16>, vector<32x128xbf16>, vector<64x128xf32> -> vector<64x128xf32>
    %8 = vector.broadcast %3 : vector<1x128xf32> to vector<64x128xf32>
    %9 = arith.addf %7, %8 : vector<64x128xf32>
    %10 = math.tanh %9 : vector<64x128xf32>
    %11 = vector.shape_cast %10 : vector<64x128xf32> to vector<8x8x128xf32>
    %12 = vector.shape_cast %4 : vector<1x128xf32> to vector<1x1x128xf32>
    %13 = vector.broadcast %12 : vector<1x1x128xf32> to vector<8x8x128xf32>
    %14 = arith.mulf %11, %13 : vector<8x8x128xf32>
    %cst_10 = arith.constant dense<0.000000e+00> : vector<8x8xf32>
    %15 = vector.multi_reduction <add>, %14, %cst_10 [2] : vector<8x8x128xf32> to vector<8x8xf32>
    %c0_i32 = arith.constant 0 : i32
    %16 = vector.broadcast %c0_i32 : i32 to vector<8x8xi32>
    %17 = arith.cmpi ne, %1, %16 : vector<8x8xi32>
    %cst_11 = arith.constant 0xFF800000 : f32
    %18 = vector.broadcast %cst_11 : f32 to vector<8x8xf32>
    %19 = arith.select %17, %15, %18 : vector<8x8xi1>, vector<8x8xf32>
    %cst_12 = arith.constant dense<0xFF800000> : vector<8xf32>
    %20 = vector.multi_reduction <maximumf>, %19, %cst_12 [1] : vector<8x8xf32> to vector<8xf32>
    %21 = vector.shape_cast %20 : vector<8xf32> to vector<8x1xf32>
    %22 = vector.broadcast %21 : vector<8x1xf32> to vector<8x8xf32>
    %23 = arith.subf %19, %22 : vector<8x8xf32>
    %24 = math.exp %23 : vector<8x8xf32>
    %cst_13 = arith.constant dense<0.000000e+00> : vector<8xf32>
    %25 = vector.multi_reduction <add>, %24, %cst_13 [1] : vector<8x8xf32> to vector<8xf32>
    %26 = vector.shape_cast %25 : vector<8xf32> to vector<8x1xf32>
    %27 = tpu.reciprocal %26 {approx = true} : vector<8x1xf32> -> vector<8x1xf32>
    %28 = vector.broadcast %27 : vector<8x1xf32> to vector<8x8xf32>
    %29 = arith.mulf %24, %28 : vector<8x8xf32>
    %c0_14 = arith.constant 0 : index
    %c0_15 = arith.constant 0 : index
    %30 = vector.load %arg7[%c0_14, %c0_15] : memref<8x8xf32, #tpu.memory_space<vmem>>, vector<8x8xf32>
    tpu.vector_store %arg7[%c0_14, %c0_15], %29 {strides = array<i32>} : memref<8x8xf32, #tpu.memory_space<vmem>>, vector<8x8xf32>,
    %31 = vector.shape_cast %29 : vector<8x8xf32> to vector<8x8x1xf32>
    %32 = vector.broadcast %31 : vector<8x8x1xf32> to vector<8x8x32xf32>
    %33 = arith.mulf %32, %0 : vector<8x8x32xf32>
    %cst_16 = arith.constant dense<0.000000e+00> : vector<8x32xf32>
    %34 = vector.multi_reduction <add>, %33, %cst_16 [1] : vector<8x8x32xf32> to vector<8x32xf32>
    %c0_17 = arith.constant 0 : index
    %c0_18 = arith.constant 0 : index
    %35 = vector.load %arg6[%c0_17, %c0_18] : memref<8x32xf32, #tpu.memory_space<vmem>>, vector<8x32xf32>
    tpu.vector_store %arg6[%c0_17, %c0_18], %34 {strides = array<i32>} : memref<8x32xf32, #tpu.memory_space<vmem>>, vector<8x32xf32>,
    return
  }
  func.func @transform_0(%arg0: i32) -> (i32, i32, i32) {
    %c0_i32 = arith.constant 0 : i32
    %c0_i32_0 = arith.constant 0 : i32
    %c0_i32_1 = arith.constant 0 : i32
    return %arg0, %c0_i32, %c0_i32_0 : i32, i32, i32
  }
  func.func @transform_1(%arg0: i32) -> (i32, i32) {
    %c0_i32 = arith.constant 0 : i32
    %c0_i32_0 = arith.constant 0 : i32
    return %arg0, %c0_i32 : i32, i32
  }
  func.func @transform_2(%arg0: i32) -> (i32, i32) {
    %c0_i32 = arith.constant 0 : i32
    %c0_i32_0 = arith.constant 0 : i32
    %c0_i32_1 = arith.constant 0 : i32
    return %c0_i32, %c0_i32_0 : i32, i32
  }
  func.func @transform_3(%arg0: i32) -> (i32, i32) {
    %c0_i32 = arith.constant 0 : i32
    %c0_i32_0 = arith.constant 0 : i32
    %c0_i32_1 = arith.constant 0 : i32
    return %c0_i32, %c0_i32_0 : i32, i32
  }
  func.func @transform_4(%arg0: i32) -> (i32, i32) {
    %c0_i32 = arith.constant 0 : i32
    %c0_i32_0 = arith.constant 0 : i32
    %c0_i32_1 = arith.constant 0 : i32
    return %c0_i32, %c0_i32_0 : i32, i32
  }
  func.func @transform_5(%arg0: i32) -> (i32, i32) {
    %c0_i32 = arith.constant 0 : i32
    %c0_i32_0 = arith.constant 0 : i32
    return %arg0, %c0_i32 : i32, i32
  }
  func.func @transform_6(%arg0: i32) -> (i32, i32) {
    %c0_i32 = arith.constant 0 : i32
    %c0_i32_0 = arith.constant 0 : i32
    return %arg0, %c0_i32 : i32, i32
  }
}

</mosaic_0001>

<bundles_post_ra>
// kernel: attention_forward.1
= control target key start
LH: loop header
LB: loop body
LE: loop exit
PB: predicated region body
PF: predicated region fallthrough
CT: control target
= control target key end

     0   :  { %vm60_vm0 = vcmask 261120   ;;  %v185_v48 = vlaneseq  ;;  %vm219_vm1 = vcmask 1041409   ;;  %vm221_vm2 = vcmask 1042434   ;;  %s598_s2 = inlined_call_operand.vmem [shape: bf16[32,128], index: 2, kind: input, shape index: {}]   ;;  %s599_s0 = inlined_call_operand.vmem [shape: f32[8,8,32], index: 0, kind: input, shape index: {}]   ;;  %s600_s3 = inlined_call_operand.vmem [shape: f32[1,128], index: 3, kind: input, shape index: {}]   ;;  %s601_s4 = inlined_call_operand.vmem [shape: f32[1,128], index: 4, kind: input, shape index: {}]   ;;  %s602_s1 = inlined_call_operand.vmem [shape: s32[8,8], index: 1, kind: input, shape index: {}]   ;;  %s603_s6 = inlined_call_operand.vmem [shape: f32[8,8], index: 6, kind: output, shape index: {1}]   ;;  %s604_s5 = inlined_call_operand.vmem [shape: f32[8,32], index: 5, kind: output, shape index: {0}]  }
   0x1   :  { %v423_v0 = vld [vmem:[%s598_s2] sm:$0xff]   ;;  %v424_v1 = vld [vmem:[%s598_s2 + $0x8] sm:$0xff]   ;;  %v499_v4 = vld [vmem:[%s599_s0 + $0x10] sm:$0xff]  ;;  %vm223_vm3 = vcmask 1043459   ;;  %vm225_vm4 = vcmask 1044484   ;;  %vm227_vm5 = vcmask 1045509  }
   0x2   :  { %407 = vmatprep.subr.bf16.mxu0 %v423_v0  ;;  %419 = vmatprep.subr.bf16.mxu1 %v423_v0  ;;  %v489_v2 = vld [vmem:[%s599_s0] sm:$0xff]  ;;  %v494_v3 = vld [vmem:[%s599_s0 + $0x8] sm:$0xff]  ;;  %v506_v6 = vld [vmem:[%s599_s0 + $0x18] sm:$0xff]  ;;  %v186_v49 = vand.u32 127, %v185_v48  ;;  %v544_v50 = vshrl.u32 %v185_v48, 7  ;;  %vm229_vm6 = vcmask 1046534  }
   0x3   :  { %408 = vmatpush3.bf16.msra.mxu0 %v423_v0  ;;  %421 = vmatpush3.bf16.msra.mxu1 %v423_v0  ;;  %v38_v5 = vpack.c.bf16 %v494_v3, %v489_v2  ;;  %v511_v7 = vld [vmem:[%s599_s0 + $0x20] sm:$0xff]  ;;  %v516_v8 = vld [vmem:[%s599_s0 + $0x28] sm:$0xff]  ;;  %v523_v10 = vld [vmem:[%s599_s0 + $0x30] sm:$0xff]  ;;  %v39_v12 = vpack.c.bf16 %v506_v6, %v499_v4  ;;  %vm231_vm7 = vcmask 1047559   ;;  %vm235_vm9 = vcmask 64512  }
   0x4   :  { %409 = vmatprep.subr.bf16.mxu0 %v424_v1  ;;  %420 = vmatprep.subr.bf16.mxu1 %v424_v1  ;;  %v40_v9 = vpack.c.bf16 %v516_v8, %v511_v7  ;;  %v528_v11 = vld [vmem:[%s599_s0 + $0x38] sm:$0xff]  ;;  %v393_v14 = vld [vmem:[%s600_s3] ss:$0 sm:$0xff]  ;;  %v189_v53 = vsub.s32 %v186_v49, %v544_v50 }
   0x5   :  { %411 = vmatprep.mubr.msk.bf16.mxu0 %vm60_vm0, %v38_v5  ;;  %v41_v13 = vpack.c.bf16 %v528_v11, %v523_v10  ;;  %v400_v31 = vld [vmem:[%s601_s4] ss:$0 sm:$0xff] }
   0x6   :  { %415 = vmatprep.mubr.msk.bf16.mxu1 %vm60_vm0, %v40_v9 }
   0x7   :  { %410 = vmatpush3.bf16.msra.mxu0 %v424_v1  ;;  %422 = vmatpush3.bf16.msra.mxu1 %v424_v1 }
   0xa   :  { %412 = vmatmul.mubr.msk.bf16.vlgmr.msra.gmra.mrb[0].mxu0 %vm60_vm0, %v39_v12  ;;  %416 = vmatmul.mubr.msk.bf16.vlgmr.msra.gmra.mrb[0].mxu1 %vm60_vm0, %v41_v13  ;;  %v31_v12 = vld [vmem:[%s602_s1] sm:$0xff] }
   0xb   :  { %vm176_vm8 = vcmp.ne.s32.totalorder %v31_v12, 0 }
  0xdd   :  { %v413_v15 = vpop.f32.mrb[0].mxu0  ;;  %v417_v16 = vpop.f32.mrb[0].mxu1 }
  0xde   :  { %v116_v17 = vadd.f32 %v413_v15, %v393_v14  ;;  %v107_v18 = vpop.f32.mrb[1].mxu0  ;;  %v123_v19 = vpop.f32.mrb[1].mxu1  ;;  %v132_v30 = vadd.f32 %v417_v16, %v393_v14 }
  0xdf   :  { %v108_v20 = vadd.f32 %v393_v14, %v107_v18  ;;  %v414_v21 = vpop.f32.mrb[2].mxu0  ;;  %v418_v22 = vpop.f32.mrb[2].mxu1  ;;  %v124_v27 = vadd.f32 %v393_v14, %v123_v19 }
  0xe0   :  { %425 = vtanh.f32 %v116_v17  ;;  %v119_v23 = vadd.f32 %v414_v21, %v393_v14  ;;  %v110_v24 = vpop.f32.mrb[3].mxu0  ;;  %v126_v25 = vpop.f32.mrb[3].mxu1  ;;  %v135_v29 = vadd.f32 %v418_v22, %v393_v14 }
  0xe1   :  { %427 = vtanh.f32 %v108_v20  ;;  %v111_v26 = vadd.f32 %v393_v14, %v110_v24  ;;  %v127_v28 = vadd.f32 %v393_v14, %v126_v25 }
  0xe2   :  { %429 = vtanh.f32 %v119_v23 }
  0xe3   :  { %431 = vtanh.f32 %v111_v26 }
  0xe4   :  { %433 = vtanh.f32 %v124_v27 }
  0xe5   :  { %435 = vtanh.f32 %v127_v28  ;;  %v257_v28 = vsub.s32 1, %v544_v50 }
  0xe6   :  { %437 = vtanh.f32 %v135_v29  ;;  %v250_v29 = vsub.s32 0, %v544_v50 }
  0xe7   :  { %439 = vtanh.f32 %v132_v30 }
  0xea   :  { %v426_v32 = vpop.eup %425 }
  0xeb   :  { %v428_v33 = vpop.eup %427  ;;  %v154_v34 = vmul.f32 %v426_v32, %v400_v31 }
  0xec   :  { %v430_v35 = vpop.eup %429  ;;  %v152_v36 = vmul.f32 %v428_v33, %v400_v31 }
  0xed   :  { %v432_v37 = vpop.eup %431  ;;  %164 = vadd.xlane.f32.xlu1 %v154_v34  ;;  %v155_v38 = vmul.f32 %v430_v35, %v400_v31  ;;  %v264_v34 = vsub.s32 2, %v544_v50  ;;  %v278_v35 = vsub.s32 4, %v544_v50 }
  0xee   :  { %160 = vadd.xlane.f32.xlu0 %v152_v36  ;;  %v434_v39 = vpop.eup %433  ;;  %v153_v40 = vmul.f32 %v432_v37, %v400_v31 }
  0xef   :  { %v436_v41 = vpop.eup %435  ;;  %v156_v44 = vmul.f32 %v434_v39, %v400_v31  ;;  %v292_v39 = vsub.s32 6, %v544_v50 }
  0xf0   :  { %v157_v42 = vmul.f32 %v436_v41, %v400_v31  ;;  %v438_v43 = vpop.eup %437 }
  0xf1   :  { %166 = vadd.xlane.f32.xlu1 %v155_v38  ;;  %v440_v45 = vpop.eup %439  ;;  %v159_v46 = vmul.f32 %v438_v43, %v400_v31  ;;  %v271_v38 = vsub.s32 3, %v544_v50 }
  0xf2   :  { %162 = vadd.xlane.f32.xlu0 %v153_v40  ;;  %v158_v47 = vmul.f32 %v440_v45, %v400_v31 }
  0xf5   :  { %170 = vadd.xlane.f32.xlu1 %v157_v42  ;;  %v285_v42 = vsub.s32 5, %v544_v50 }
  0xf6   :  { %168 = vadd.xlane.f32.xlu0 %v156_v44  ;;  %v299_v44 = vsub.s32 7, %v544_v50 }
  0xf9   :  { %174 = vadd.xlane.f32.xlu1 %v159_v46 }
  0xfa   :  { %172 = vadd.xlane.f32.xlu0 %v158_v47 }
 0x17a   :  { %v165_v51 = vpop.xlane.xlu1 %164 }
 0x17b   :  { %v161_v52 = vpop.xlane.xlu0 %160  ;;  %v198_v58 = vrot.slane %v165_v51, %v189_v53 }
 0x17c   :  { %v190_v56 = vrot.slane %v161_v52, %v189_v53 }
 0x17e   :  { %v167_v54 = vpop.xlane.xlu1 %166 }
 0x17f   :  { %v163_v55 = vpop.xlane.xlu0 %162  ;;  %v202_v59 = vrot.slane %v167_v54, %v189_v53 }
 0x180   :  { %v194_v57 = vrot.slane %v163_v55, %v189_v53 }
 0x182   :  { %v220_v60 = vsel %vm219_vm1, %v194_v57, %v190_v56  ;;  %v171_v61 = vpop.xlane.xlu1 %170 }
 0x183   :  { %v222_v62 = vsel %vm221_vm2, %v198_v58, %v220_v60  ;;  %v169_v63 = vpop.xlane.xlu0 %168  ;;  %v210_v13 = vrot.slane %v171_v61, %v189_v53 }
 0x184   :  { %v224_v0 = vsel %vm223_vm3, %v202_v59, %v222_v62  ;;  %v206_v1 = vrot.slane %v169_v63, %v189_v53 }
 0x186   :  { %v226_v5 = vsel %vm225_vm4, %v206_v1, %v224_v0  ;;  %v175_v9 = vpop.xlane.xlu1 %174 }
 0x187   :  { %v173_v14 = vpop.xlane.xlu0 %172  ;;  %v218_v16 = vrot.slane %v175_v9, %v189_v53  ;;  %v228_v17 = vsel %vm227_vm5, %v210_v13, %v226_v5 }
 0x188   :  { %v214_v15 = vrot.slane %v173_v14, %v189_v53 }
 0x18a   :  { %v230_v18 = vsel %vm229_vm6, %v214_v15, %v228_v17 }
 0x18b   :  { %v232_v19 = vsel %vm231_vm7, %v218_v16, %v230_v18 }
 0x18c   :  { %v234_v20 = vsel %vm176_vm8, %v232_v19, -inf }
 0x18d   :  { %v236_v21 = vsel %vm235_vm9, %v234_v20, -inf }
 0x18e   :  { %237 = vmax.xlane.f32.xlu0 %v236_v21 }
 0x21b   :  { %v238_v22 = vpop.xlane.xlu0 %237 }
 0x21c   :  { %v239_v23 = vsub.f32 %v234_v20, %v238_v22 }
 0x21e   :  { %v240_v24 = vmul.f32 1.442695, %v239_v23 }
 0x220   :  { %441 = vpow2.f32 %v240_v24 }
 0x22a   :  { %v442_v25 = vpop.eup %441 }
 0x22b   :  { %v242_v26 = vsel %vm235_vm9, %v442_v25, 0.0 }
 0x22c   :  { %243 = vadd.xlane.f32.xlu1 %v242_v26 }
 0x2b9   :  { %v244_v27 = vpop.xlane.xlu1 %243 }
 0x2ba   :  { %443 = vrcp.f32 %v244_v27 }
 0x2c4   :  { %v444_v30 = vpop.eup %443 }
 0x2c5   :  { %v246_v31 = vmul.f32 %v444_v30, %v442_v25 }
 0x2c7   :  { %247 = vst.msk [vmem:[%s603_s6] sm:$0xff] %vm235_vm9, %v246_v31  ;;  %v258_v32 = vrot.slane %v246_v31, %v257_v28  ;;  %v251_v33 = vrot.slane %v246_v31, %v250_v29  ;;  %v265_v36 = vrot.slane %v246_v31, %v264_v34  ;;  %v279_v37 = vrot.slane %v246_v31, %v278_v35 }
 0x2c8   :  { %v272_v40 = vrot.slane %v246_v31, %v271_v38  ;;  %v293_v41 = vrot.slane %v246_v31, %v292_v39  ;;  %v286_v43 = vrot.slane %v246_v31, %v285_v42  ;;  %v300_v45 = vrot.slane %v246_v31, %v299_v44 }
 0x2c9   :  { %260 = vbcast.lane.b32.xlu1 %v258_v32, 256  ;;  %253 = vbcast.lane.b32.xlu0 %v251_v33, 256 }
 0x2cd   :  { %267 = vbcast.lane.b32.xlu1 %v265_v36, 256  ;;  %281 = vbcast.lane.b32.xlu0 %v279_v37, 256 }
 0x2d1   :  { %274 = vbcast.lane.b32.xlu1 %v272_v40, 256  ;;  %295 = vbcast.lane.b32.xlu0 %v293_v41, 256 }
 0x2d5   :  { %288 = vbcast.lane.b32.xlu1 %v286_v43, 256 }
 0x2d9   :  { %302 = vbcast.lane.b32.xlu1 %v300_v45, 256 }
 0x33b   :  { %v261_v46 = vpop.permute.xlu1 %260  ;;  %v254_v47 = vpop.permute.xlu0 %253 }
 0x33c   :  { %v305_v48 = vmul.f32 %v261_v46, %v494_v3  ;;  %v304_v49 = vmul.f32 %v254_v47, %v489_v2 }
 0x33e   :  { %v319_v51 = vsel %vm60_vm0, %v305_v48, 0.0  ;;  %v312_v52 = vsel %vm60_vm0, %v304_v49, 0.0 }
 0x33f   :  { %v320_v53 = vrot.slane %v319_v51, 4  ;;  %v313_v54 = vrot.slane %v312_v52, 4  ;;  %v268_v55 = vpop.permute.xlu1 %267  ;;  %v282_v56 = vpop.permute.xlu0 %281 }
 0x340   :  { %v306_v57 = vmul.f32 %v268_v55, %v499_v4  ;;  %v308_v50 = vmul.f32 %v282_v56, %v511_v7 }
 0x341   :  { %v321_v58 = vadd.f32 %v320_v53, %v319_v51  ;;  %v314_v59 = vadd.f32 %v313_v54, %v312_v52 }
 0x342   :  { %v326_v60 = vsel %vm60_vm0, %v306_v57, 0.0  ;;  %v340_v3 = vsel %vm60_vm0, %v308_v50, 0.0 }
 0x343   :  { %v322_v61 = vrot.slane %v321_v58, 2  ;;  %v315_v2 = vrot.slane %v314_v59, 2  ;;  %v327_v62 = vrot.slane %v326_v60, 4  ;;  %v341_v63 = vrot.slane %v340_v3, 4  ;;  %v275_v0 = vpop.permute.xlu1 %274  ;;  %v296_v1 = vpop.permute.xlu0 %295 }
 0x344   :  { %v307_v5 = vmul.f32 %v275_v0, %v506_v6  ;;  %v310_v9 = vmul.f32 %v296_v1, %v523_v10 }
 0x345   :  { %v323_v12 = vadd.f32 %v322_v61, %v321_v58  ;;  %v328_v4 = vadd.f32 %v327_v62, %v326_v60  ;;  %v342_v13 = vadd.f32 %v341_v63, %v340_v3  ;;  %v316_v7 = vadd.f32 %v315_v2, %v314_v59 }
 0x346   :  { %v333_v14 = vsel %vm60_vm0, %v307_v5, 0.0  ;;  %v354_v15 = vsel %vm60_vm0, %v310_v9, 0.0 }
 0x347   :  { %v329_v16 = vrot.slane %v328_v4, 2  ;;  %v289_v17 = vpop.permute.xlu1 %288  ;;  %v343_v18 = vrot.slane %v342_v13, 2  ;;  %v334_v19 = vrot.slane %v333_v14, 4  ;;  %v355_v20 = vrot.slane %v354_v15, 4 }
 0x348   :  { %v309_v21 = vmul.f32 %v289_v17, %v516_v8  ;;  %v324_v22 = vrot.slane %v323_v12, 1  ;;  %v317_v6 = vrot.slane %v316_v7, 1 }
 0x349   :  { %v330_v23 = vadd.f32 %v329_v16, %v328_v4  ;;  %v335_v24 = vadd.f32 %v334_v19, %v333_v14  ;;  %v356_v10 = vadd.f32 %v355_v20, %v354_v15  ;;  %v344_v29 = vadd.f32 %v343_v18, %v342_v13 }
 0x34a   :  { %v347_v25 = vsel %vm60_vm0, %v309_v21, 0.0  ;;  %v325_v34 = vadd.f32 %v324_v22, %v323_v12  ;;  %v318_v35 = vadd.f32 %v317_v6, %v316_v7 }
 0x34b   :  { %v331_v26 = vrot.slane %v330_v23, 1  ;;  %v348_v27 = vrot.slane %v347_v25, 4  ;;  %v303_v28 = vpop.permute.xlu1 %302  ;;  %v336_v30 = vrot.slane %v335_v24, 2  ;;  %v357_v31 = vrot.slane %v356_v10, 2 }
 0x34c   :  { %v311_v32 = vmul.f32 %v303_v28, %v528_v11  ;;  %v345_v40 = vrot.slane %v344_v29, 1  ;;  %v376_v45 = vsel %vm219_vm1, %v325_v34, %v318_v35 }
 0x34d   :  { %v349_v33 = vadd.f32 %v348_v27, %v347_v25  ;;  %v337_v36 = vadd.f32 %v336_v30, %v335_v24  ;;  %v332_v37 = vadd.f32 %v331_v26, %v330_v23  ;;  %v358_v42 = vadd.f32 %v357_v31, %v356_v10 }
 0x34e   :  { %v361_v8 = vsel %vm60_vm0, %v311_v32, 0.0  ;;  %v346_v49 = vadd.f32 %v345_v40, %v344_v29 }
 0x34f   :  { %v350_v38 = vrot.slane %v349_v33, 2  ;;  %v362_v39 = vrot.slane %v361_v8, 4  ;;  %v338_v41 = vrot.slane %v337_v36, 1  ;;  %v377_v47 = vsel %vm221_vm2, %v332_v37, %v376_v45 }
 0x350   :  { %v359_v52 = vrot.slane %v358_v42, 1 }
 0x351   :  { %v351_v43 = vadd.f32 %v350_v38, %v349_v33  ;;  %v363_v44 = vadd.f32 %v362_v39, %v361_v8  ;;  %v339_v46 = vadd.f32 %v338_v41, %v337_v36 }
 0x352   :  { %v360_v50 = vadd.f32 %v359_v52, %v358_v42 }
 0x353   :  { %v352_v11 = vrot.slane %v351_v43, 1  ;;  %v364_v48 = vrot.slane %v363_v44, 2  ;;  %v378_v51 = vsel %vm223_vm3, %v339_v46, %v377_v47 }
 0x354   :  { %v379_v55 = vsel %vm225_vm4, %v346_v49, %v378_v51 }
 0x355   :  { %v353_v53 = vadd.f32 %v352_v11, %v351_v43  ;;  %v365_v54 = vadd.f32 %v364_v48, %v363_v44 }
 0x357   :  { %v380_v56 = vsel %vm227_vm5, %v353_v53, %v379_v55  ;;  %v366_v57 = vrot.slane %v365_v54, 1 }
 0x358   :  { %v381_v59 = vsel %vm229_vm6, %v360_v50, %v380_v56 }
 0x359   :  { %v367_v58 = vadd.f32 %v366_v57, %v365_v54 }
 0x35b   :  { %v382_v60 = vsel %vm231_vm7, %v367_v58, %v381_v59 }
 0x35c   :  { %384 = vst.msk [vmem:[%s604_s5] sm:$0xff] %vm60_vm0, %v382_v60 }

</bundles_post_ra>
